<compile_context>
chip_gen: v7x
topology: tpu7x:2x2x1
jax: 0.10.0
libtpu: 0.0.40
codegen_flags: <defaults>
</compile_context>

<pallas_src>
import functools

import jax
import jax.numpy as jnp
from jax import lax
from jax.experimental import pallas as pl
from jax.experimental.pallas import tpu as pltpu

LANE = 128
BLOCK_ROWS = 4096                   # (4096,128) f32 = 2 MiB per pipeline buffer
SINGLE_SHOT_MAX_ROWS = BLOCK_ROWS   # <= one block -> no grid, whole tile in VMEM


def _sigmoid(x):
    # sigmoid(x) == 0.5*tanh(0.5*x) + 0.5 : one EUP op (vtanh) per vreg instead
    # of two (vexp + vrcp); the extra mul/adds ride the 4-wide VALU for free.
    return 0.5 * jnp.tanh(0.5 * x) + 0.5


def _dice_single_kernel(x_ref, t_ref, o_ref, *, n, total):
    """Single-invocation path: whole (rows, 128) tile resident in VMEM.

    o_ref is SMEM f32[2]: [intersection, sum(sigmoid(x)) + sum(t)].
    """
    x = x_ref[...].astype(jnp.float32)
    t = t_ref[...].astype(jnp.float32)
    s = _sigmoid(x)

    if n != total:  # static: only traced when zero padding exists
        rows, lanes = x_ref.shape
        row_i = lax.broadcasted_iota(jnp.int32, (rows, lanes), 0)
        lane_i = lax.broadcasted_iota(jnp.int32, (rows, lanes), 1)
        mask = (row_i * lanes + lane_i) < n
        s = jnp.where(mask, s, 0.0)
        t = jnp.where(mask, t, 0.0)

    o_ref[0] = jnp.sum(s * t)          # intersection
    o_ref[1] = jnp.sum(s + t)          # sum(sigmoid(x)) + sum(targets)


def _dice_tiled_kernel(x_ref, t_ref, prod_ref, den_ref, *, rows_total):
    """Tiled path: each step writes a single-vreg (8,128) partial-sum pair.

    No carried accumulator -> steps are independent ("parallel" axis, megacore
    shardable on v7x) and there is no full-tile read-modify-write.
    """
    i = pl.program_id(0)
    rows, lanes = x_ref.shape

    x = x_ref[...].astype(jnp.float32)
    t = t_ref[...].astype(jnp.float32)
    s = _sigmoid(x)

    if rows_total % rows != 0:  # static: a ragged last block exists
        # Only the final block is partial; compare the block-local row index
        # against the remaining valid-row count (scalar) -> no flat-index
        # int32 overflow for any realistic input size.
        row_i = lax.broadcasted_iota(jnp.int32, (rows, lanes), 0)
        valid_rows = rows_total - i * rows
        mask = row_i < valid_rows
        s = jnp.where(mask, s, 0.0)
        t = jnp.where(mask, t, 0.0)

    # Layout-preserving reshape (no data movement) + leading-axis sum:
    # pure vreg-wise VPU adds down to one (8,128) vreg per quantity.
    prod = (s * t).reshape(-1, 8, LANE)
    den = (s + t).reshape(-1, 8, LANE)
    prod_ref[...] = jnp.sum(prod, axis=0, keepdims=True)
    den_ref[...] = jnp.sum(den, axis=0, keepdims=True)


def dice_loss(inputs, targets, smooth=1.0):
    """Pallas TPU implementation of DiceLoss.forward."""
    assert inputs.shape == targets.shape
    x = inputs.reshape(-1)
    t = targets.reshape(-1)
    n = x.shape[0]

    rows_ceil = pl.cdiv(n, LANE)
    if rows_ceil <= SINGLE_SHOT_MAX_ROWS:
        # -------- small path: one kernel invocation, SMEM scalar outputs ----
        total = rows_ceil * LANE
        pad = total - n
        if pad:
            # Tiny arrays only (<= 512K elements); pad value is masked away.
            x = jnp.pad(x, (0, pad))
            t = jnp.pad(t, (0, pad))
        x2 = x.reshape(rows_ceil, LANE)
        t2 = t.reshape(rows_ceil, LANE)
        kernel = functools.partial(_dice_single_kernel, n=n, total=total)
        partials = pl.pallas_call(
            kernel,
            out_shape=jax.ShapeDtypeStruct((2,), jnp.float32),
            out_specs=pl.BlockSpec(memory_space=pltpu.SMEM),
        )(x2, t2)
        inter = partials[0]
        denom_sum = partials[1]
    else:
        # -------- large path: tiled, per-step (8,128) partials ---------------
        rows_total = n // LANE          # lane-aligned prefix (no jnp.pad copy)
        aligned = rows_total * LANE
        num_steps = pl.cdiv(rows_total, BLOCK_ROWS)

        x2 = x[:aligned].reshape(rows_total, LANE)
        t2 = t[:aligned].reshape(rows_total, LANE)

        kernel = functools.partial(_dice_tiled_kernel, rows_total=rows_total)
        part_shape = jax.ShapeDtypeStruct((num_steps, 8, LANE), jnp.float32)
        prod_parts, den_parts = pl.pallas_call(
            kernel,
            out_shape=(part_shape, part_shape),
            grid_spec=pltpu.PrefetchScalarGridSpec(
                num_scalar_prefetch=0,
                grid=(num_steps,),
                in_specs=[
                    pl.BlockSpec((BLOCK_ROWS, LANE), lambda i: (i, 0)),
                    pl.BlockSpec((BLOCK_ROWS, LANE), lambda i: (i, 0)),
                ],
                out_specs=[
                    pl.BlockSpec((1, 8, LANE), lambda i: (i, 0, 0)),
                    pl.BlockSpec((1, 8, LANE), lambda i: (i, 0, 0)),
                ],
            ),
            compiler_params=pltpu.CompilerParams(
                dimension_semantics=("parallel",),  # megacore shard on v7x
            ),
        )(x2, t2)

        inter = jnp.sum(prod_parts)
        denom_sum = jnp.sum(den_parts)

        rem = n - aligned
        if rem:  # < 128 trailing elements: cheaper in plain jnp than a pad copy
            sr = jax.nn.sigmoid(x[aligned:].astype(jnp.float32))
            tr = t[aligned:].astype(jnp.float32)
            inter = inter + jnp.sum(sr * tr)
            denom_sum = denom_sum + jnp.sum(sr) + jnp.sum(tr)

    dice = (2.0 * inter + smooth) / (denom_sum + smooth)
    return 1.0 - dice


def _dice_loss_ref(inputs, targets, smooth=1.0):
    s = jax.nn.sigmoid(inputs.astype(jnp.float32)).reshape(-1)
    t = targets.astype(jnp.float32).reshape(-1)
    inter = jnp.sum(s * t)
    dice = (2.0 * inter + smooth) / (jnp.sum(s) + jnp.sum(t) + smooth)
    return 1.0 - dice


if __name__ == "__main__":
    key = jax.random.PRNGKey(0)
    k1, k2, k3, k4 = jax.random.split(key, 4)

    # Primary small case: NCHW logits + binary masks, like a segmentation head.
    x = jax.random.normal(k1, (2, 4, 16, 16), dtype=jnp.float32)
    t = (jax.random.uniform(k2, (2, 4, 16, 16)) > 0.5).astype(jnp.float32)
    loss = dice_loss(x, t, smooth=1.0)
    jax.block_until_ready(loss)
    ref = _dice_loss_ref(x, t, smooth=1.0)
    assert jnp.allclose(loss, ref, rtol=1e-5, atol=1e-5), (loss, ref)

    # Also exercise the tiled path (ragged last block + <128-element tail).
    xb = jax.random.normal(k3, (999, 777), dtype=jnp.float32)
    tb = (jax.random.uniform(k4, (999, 777)) > 0.5).astype(jnp.float32)
    loss_b = dice_loss(xb, tb, smooth=1.0)
    jax.block_until_ready(loss_b)
    ref_b = _dice_loss_ref(xb, tb, smooth=1.0)
    assert jnp.allclose(loss_b, ref_b, rtol=1e-5, atol=1e-5), (loss_b, ref_b)

    print("KERNEL_OK")
</pallas_src>

<mosaic_0001>
module attributes {stable_mosaic.version = 11 : i64} {
  func.func @_dice_single_kernel(%arg0: memref<16x128xf32, #tpu.memory_space<vmem>>, %arg1: memref<16x128xf32, #tpu.memory_space<vmem>>, %arg2: memref<2xf32, #tpu.memory_space<smem>>) attributes {dimension_semantics = [], scalar_prefetch = 0 : i64, scratch_operands = 0 : i64, tpu.core_type = #tpu.core_type<tc>} {
    %c0 = arith.constant 0 : index
    %c0_0 = arith.constant 0 : index
    %0 = vector.load %arg0[%c0, %c0_0] : memref<16x128xf32, #tpu.memory_space<vmem>>, vector<16x128xf32>
    %c0_1 = arith.constant 0 : index
    %c0_2 = arith.constant 0 : index
    %1 = vector.load %arg1[%c0_1, %c0_2] : memref<16x128xf32, #tpu.memory_space<vmem>>, vector<16x128xf32>
    %cst = arith.constant 5.000000e-01 : f32
    %2 = vector.broadcast %cst : f32 to vector<16x128xf32>
    %3 = arith.mulf %2, %0 : vector<16x128xf32>
    %4 = math.tanh %3 : vector<16x128xf32>
    %cst_3 = arith.constant 5.000000e-01 : f32
    %5 = vector.broadcast %cst_3 : f32 to vector<16x128xf32>
    %6 = arith.mulf %5, %4 : vector<16x128xf32>
    %cst_4 = arith.constant 5.000000e-01 : f32
    %7 = vector.broadcast %cst_4 : f32 to vector<16x128xf32>
    %8 = arith.addf %6, %7 : vector<16x128xf32>
    %9 = arith.mulf %8, %1 : vector<16x128xf32>
    %10 = vector.shape_cast %9 : vector<16x128xf32> to vector<1x16x128xf32>
    %cst_5 = arith.constant dense<0.000000e+00> : vector<1xf32>
    %11 = vector.multi_reduction <add>, %10, %cst_5 [1, 2] : vector<1x16x128xf32> to vector<1xf32>
    %12 = vector.shape_cast %11 : vector<1xf32> to vector<1x1x1xf32>
    %13 = vector.extract %12[0, 0, 0] : f32 from vector<1x1x1xf32>
    %c0_6 = arith.constant 0 : index
    %14 = memref.load %arg2[%c0_6] : memref<2xf32, #tpu.memory_space<smem>>
    memref.store %13, %arg2[%c0_6] : memref<2xf32, #tpu.memory_space<smem>>
    %15 = arith.addf %8, %1 : vector<16x128xf32>
    %16 = vector.shape_cast %15 : vector<16x128xf32> to vector<1x16x128xf32>
    %cst_7 = arith.constant dense<0.000000e+00> : vector<1xf32>
    %17 = vector.multi_reduction <add>, %16, %cst_7 [1, 2] : vector<1x16x128xf32> to vector<1xf32>
    %18 = vector.shape_cast %17 : vector<1xf32> to vector<1x1x1xf32>
    %19 = vector.extract %18[0, 0, 0] : f32 from vector<1x1x1xf32>
    %c1 = arith.constant 1 : index
    %20 = memref.load %arg2[%c1] : memref<2xf32, #tpu.memory_space<smem>>
    memref.store %19, %arg2[%c1] : memref<2xf32, #tpu.memory_space<smem>>
    return
  }
}

</mosaic_0001>

<bundles_post_ra>
// kernel: tpu_custom_call.1
= control target key start
LH: loop header
LB: loop body
LE: loop exit
PB: predicated region body
PF: predicated region fallthrough
CT: control target
= control target key end

     0   :  { %7 = vsyncpa [#allocation3], 0  ;;  %s224_s0 = inlined_call_operand.hbm [shape: f32[16,128], index: 0, kind: input, shape index: {}]   ;;  %s225_s1 = inlined_call_operand.hbm [shape: f32[16,128], index: 1, kind: input, shape index: {}]   ;;  %s226_s2 = inlined_call_operand.hbm [shape: f32[2], index: 2, kind: output, shape index: {}]  }
   0x1   :  { %8 = vsyncpa [#allocation6], 0 }
   0x2   :  { %9 = vsyncpa [#allocation4], 0  ;;  %s168_s9 = smov [#allocation2]   ;;  %s108_s13 = scalar_lea.hbm %s224_s0, 256 }
   0x3   :  { %s15_s10 = sshll.u32 %s168_s9, 4  ;;  %p109_p0 = scmp.ne.s32.totalorder %s224_s0, %s108_s13  ;;  %s16_s10 = int_to_ptr.vmem [resolvable:$true] %s15_s10 }
   0x4   :  { %p112_p1 = scmp.lt.u32.totalorder %s108_s13, %s224_s0 }
   0x6   :  { %p114_p2 = pnand %p112_p1, %p109_p0 }
   0x8   :  { %117 = shalt.err (!%p114_p2)
}
   0x9   :  { %s118_s18 = scalar_lea.vmem %s16_s10, 256  ;;  %p123_p4 = scmp.lt.s32.totalorder %s16_s10, %s16_s10 }
   0xa   :  { %p119_p3 = scmp.ne.s32.totalorder %s16_s10, %s118_s18  ;;  %p124_p5 = scmp.lt.s32.totalorder %s118_s18, %s118_s18 }
   0xc   :  { %p125_p6 = por %p124_p5, %p123_p4 }
   0xe   :  { %p126_p7 = pnand %p125_p6, %p119_p3 }
  0x10   :  { %129 = shalt.err (!%p126_p7)
}
  0x11   :  { %s169_s19 = smov 128   ;;  %s170_s20 = smov 8  }
  0x12   :  { %21 = dma.hbm_to_vmem [thread:$0]  %s224_s0, 256, %s16_s10, [#allocation3], %s169_s19, %s169_s19, %s170_s20  }
  0x13   :  { %s171_s23 = smov [#allocation5]   ;;  %s130_s27 = scalar_lea.hbm %s225_s1, 256 }
  0x14   :  { %s27_s24 = sshll.u32 %s171_s23, 4  ;;  %p131_p8 = scmp.ne.s32.totalorder %s225_s1, %s130_s27  ;;  %s28_s24 = int_to_ptr.vmem [resolvable:$true] %s27_s24 }
  0x15   :  { %p134_p9 = scmp.lt.u32.totalorder %s130_s27, %s225_s1 }
  0x17   :  { %p136_p10 = pnand %p134_p9, %p131_p8 }
  0x19   :  { %139 = shalt.err (!%p136_p10)
}
  0x1a   :  { %s140_s4 = scalar_lea.vmem %s28_s24, 256  ;;  %p145_p12 = scmp.lt.s32.totalorder %s28_s24, %s28_s24 }
  0x1b   :  { %p141_p11 = scmp.ne.s32.totalorder %s28_s24, %s140_s4  ;;  %p146_p13 = scmp.lt.s32.totalorder %s140_s4, %s140_s4 }
  0x1d   :  { %p147_p0 = por %p146_p13, %p145_p12 }
  0x1f   :  { %p148_p1 = pnand %p147_p0, %p141_p11 }
  0x21   :  { %151 = shalt.err (!%p148_p1)
}
  0x22   :  { %33 = dma.hbm_to_vmem [thread:$0]  %s225_s1, 256, %s28_s24, [#allocation6], %s169_s19, %s169_s19, %s170_s20  }
  0x23   :  { %162 = dma.done.wait [#allocation3], 256  }
  0x24   :  { %163 = vsyncadd [#allocation3], 4294967040 }
  0x25   :  { %164 = dma.done.wait [#allocation6], 256  }
  0x26   :  { %165 = vsyncadd [#allocation6], 4294967040  ;;  %v40_v0 = vld [vmem:[#allocation2] sm:$0xff]  ;;  %v41_v1 = vld [vmem:[#allocation2 + $0x8] sm:$0xff]  ;;  %s152_s9 = scalar_lea.hbm %s226_s2, 16 }
  0x27   :  { %v44_v2 = vmul.f32 0.5, %v40_v0  ;;  %v45_v3 = vmul.f32 0.5, %v41_v1  ;;  %v42_v7 = vld [vmem:[#allocation5] sm:$0xff]  ;;  %v43_v9 = vld [vmem:[#allocation5 + $0x8] sm:$0xff]  ;;  %p153_p2 = scmp.ne.s32.totalorder %s226_s2, %s152_s9  ;;  %p156_p3 = scmp.lt.u32.totalorder %s152_s9, %s226_s2 }
  0x29   :  { %104 = vtanh.f32 %v44_v2  ;;  %p158_p4 = pnand %p156_p3, %p153_p2 }
  0x2a   :  { %106 = vtanh.f32 %v45_v3 }
  0x33   :  { %v105_v4 = vpop.eup %104 }
  0x34   :  { %v107_v5 = vpop.eup %106  ;;  %v48_v6 = vmul.f32 0.5, %v105_v4 }
  0x35   :  { %v49_v8 = vmul.f32 0.5, %v107_v5 }
  0x36   :  { %v50_v10 = vadd.f32 0.5, %v48_v6 }
  0x37   :  { %v51_v11 = vadd.f32 0.5, %v49_v8 }
  0x38   :  { %v52_v12 = vmul.f32 %v50_v10, %v42_v7  ;;  %v66_v14 = vadd.f32 %v50_v10, %v42_v7 }
  0x39   :  { %v53_v13 = vmul.f32 %v51_v11, %v43_v9  ;;  %v67_v15 = vadd.f32 %v51_v11, %v43_v9 }
  0x3b   :  { %v54_v16 = vadd.f32 %v53_v13, %v52_v12  ;;  %v68_v17 = vadd.f32 %v67_v15, %v66_v14 }
  0x3d   :  { %55 = vadd.xlane.f32.xlu0 %v54_v16 }
  0x41   :  { %69 = vadd.xlane.f32.xlu0 %v68_v17 }
  0xca   :  { %v56_v18 = vpop.xlane.xlu0 %55 }
  0xcb   :  { %v57_v19 = vrot.slane %v56_v18, 4 }
  0xcd   :  { %v58_v20 = vadd.f32 %v57_v19, %v56_v18 }
  0xce   :  { %v70_v21 = vpop.xlane.xlu0 %69 }
  0xcf   :  { %v59_v22 = vrot.slane %v58_v20, 2  ;;  %v71_v23 = vrot.slane %v70_v21, 4 }
  0xd1   :  { %v72_v24 = vadd.f32 %v71_v23, %v70_v21  ;;  %v60_v25 = vadd.f32 %v59_v22, %v58_v20 }
  0xd3   :  { %v73_v26 = vrot.slane %v72_v24, 2  ;;  %v61_v27 = vrot.slane %v60_v25, 1 }
  0xd5   :  { %v74_v28 = vadd.f32 %v73_v26, %v72_v24  ;;  %v62_v29 = vadd.f32 %v61_v27, %v60_v25 }
  0xd7   :  { %95 = vpush %v62_v29  ;;  %v75_v30 = vrot.slane %v74_v28, 1 }
  0xd9   :  { %v76_v31 = vadd.f32 %v75_v30, %v74_v28 }
  0xdb   :  { %97 = vpush %v76_v31 }
 0x108   :  { %s96_s1 = spop %95 }
 0x109   :  { %65 = sst [smem:[#allocation7]] %s96_s1 }
 0x10c   :  { %s98_s6 = spop %97 }
 0x10d   :  { %79 = sst [smem:[#allocation7 + $0x1]] %s98_s6 }
 0x10e   :  { %161 = shalt.err (!%p158_p4)
}
 0x10f   :  { %s172_s14 = smov [#allocation7]  }
 0x110   :  { %87 = dma.smem_to_hbm %s172_s14, 16, %s226_s2, [#allocation4]  }
 0x111   :  { %166 = dma.done.wait [#allocation4], 16  }
 0x112   :  { %167 = vsyncadd [#allocation4], 4294967280 }
 0x113   :  { %91 = sfence }
 0x114   :  { %92 = vsyncpa [#allocation3], 1 }
 0x115   :  { %93 = vsyncpa [#allocation6], 1 }
 0x116   :  { %94 = vsyncpa [#allocation4], 1 }

</bundles_post_ra>
